<compile_context>
chip_gen: v5e
topology: v5e:2x2
jax: 0.10.0
libtpu: 0.0.40
codegen_flags: <defaults>
</compile_context>

<pallas_src>
import functools

import jax
import jax.numpy as jnp
from jax.experimental import pallas as pl
from jax.experimental.pallas import tpu as pltpu

_LANES = 128
_SUBLANES = 8


def _focal_loss_kernel(x_ref, t_ref, out_ref, *, alpha, gamma, ignore_index,
                       num_classes):
    # out_ref is a per-batch accumulator: same output block for every step of the
    # inner ("arbitrary") reduction axis -> zero it on the first step.
    @pl.when(pl.program_id(1) == 0)
    def _():
        out_ref[...] = jnp.zeros_like(out_ref)

    t = t_ref[...]                               # (tile_s, 128) int32, lane-dense
    x = x_ref[...].astype(jnp.float32)           # (C, tile_s, 128), cast on load

    # Class-axis reductions unrolled over the small static class dim so they stay
    # elementwise VALU ops on full vregs (no XLU sublane/lane reduce per step).
    m = x[0]
    for c in range(1, num_classes):
        m = jnp.maximum(m, x[c])

    sumexp = jnp.zeros_like(m)
    tgt_logit = jnp.zeros_like(m)
    for c in range(num_classes):
        xc = x[c]
        sumexp = sumexp + jnp.exp(xc - m)
        tgt_logit = jnp.where(t == c, xc, tgt_logit)   # one-hot gather of target logit

    lse = jnp.log(sumexp) + m                    # numerically-stable log-sum-exp
    valid = t != ignore_index
    ce = jnp.where(valid, lse - tgt_logit, 0.0)  # cross_entropy(reduction='none')
    ce = jnp.maximum(ce, 0.0)                    # guard fp-tiny negatives -> pt <= 1
    pt = jnp.exp(-ce)
    focal = alpha * (1.0 - pt) ** gamma * ce     # exactly zero at ignored/padded px

    out_ref[...] += focal                        # elementwise VALU accumulation


def focal_loss(inputs, targets, *, alpha=0.25, gamma=2, size_average=True,
               ignore_index=255, tile_rows=512):
    """inputs: (N, C, H, W) float logits; targets: (N, H, W) int labels.

    tile_rows: sublane-rows per grid step (x 128 lanes = pixels per step).
    """
    N, C, H, W = inputs.shape
    HW = H * W
    P = N * HW                                   # torch .mean() divides by full numel

    # Pixel axis -> (s_pad, 128) lane-dense view; pad extra pixels with ignore_index
    # so they contribute exactly 0 to the sum.
    s_rows = pl.cdiv(HW, _LANES)
    tile_cap = max(_SUBLANES, (int(tile_rows) // _SUBLANES) * _SUBLANES)
    tile_s = min(tile_cap, pl.cdiv(s_rows, _SUBLANES) * _SUBLANES)
    s_pad = pl.cdiv(s_rows, tile_s) * tile_s
    hw_pad = s_pad * _LANES

    x = inputs.reshape(N, C, HW)                 # free reshape, no transpose, native dtype
    t = targets.reshape(N, HW).astype(jnp.int32)
    if hw_pad != HW:
        x = jnp.pad(x, ((0, 0), (0, 0), (0, hw_pad - HW)))
        t = jnp.pad(t, ((0, 0), (0, hw_pad - HW)), constant_values=ignore_index)
    x = x.reshape(N, C, s_pad, _LANES)
    t = t.reshape(N, s_pad, _LANES)

    kernel = functools.partial(
        _focal_loss_kernel, alpha=alpha, gamma=gamma,
        ignore_index=ignore_index, num_classes=C)

    partial = pl.pallas_call(
        kernel,
        out_shape=jax.ShapeDtypeStruct((N, tile_s, _LANES), jnp.float32),
        grid_spec=pltpu.PrefetchScalarGridSpec(
            num_scalar_prefetch=0,
            grid=(N, s_pad // tile_s),           # reduction axis last
            in_specs=[
                pl.BlockSpec((None, C, tile_s, _LANES), lambda n, j: (n, 0, j, 0)),
                pl.BlockSpec((None, tile_s, _LANES), lambda n, j: (n, j, 0)),
            ],
            out_specs=pl.BlockSpec((None, tile_s, _LANES), lambda n, j: (n, 0, 0)),
        ),
        compiler_params=pltpu.CompilerParams(
            dimension_semantics=("parallel", "arbitrary")),
    )(x, t)

    total = jnp.sum(partial)                     # tiny final cross-lane reduce in XLA
    if size_average:
        return total / P
    return total


def _focal_loss_ref(inputs, targets, *, alpha=0.25, gamma=2, size_average=True,
                    ignore_index=255):
    """Pure-JAX reference for correctness checking."""
    N, C, H, W = inputs.shape
    x = jnp.transpose(inputs, (0, 2, 3, 1)).reshape(-1, C).astype(jnp.float32)
    t = targets.reshape(-1).astype(jnp.int32)
    lse = jax.scipy.special.logsumexp(x, axis=-1)
    safe_t = jnp.where(t == ignore_index, 0, t)
    tgt_logit = jnp.take_along_axis(x, safe_t[:, None], axis=-1)[:, 0]
    ce = jnp.where(t == ignore_index, 0.0, lse - tgt_logit)
    pt = jnp.exp(-ce)
    focal = alpha * (1.0 - pt) ** gamma * ce
    return focal.mean() if size_average else focal.sum()


if __name__ == "__main__":
    key = jax.random.PRNGKey(0)
    k1, k2, k3 = jax.random.split(key, 3)

    # Primary small test: NCHW logits + int targets with some ignore_index pixels.
    N, C, H, W = 2, 4, 16, 16
    inputs = jax.random.normal(k1, (N, C, H, W), dtype=jnp.float32)
    targets = jax.random.randint(k2, (N, H, W), 0, C, dtype=jnp.int32)
    ignore_mask = jax.random.bernoulli(k3, 0.1, (N, H, W))
    targets = jnp.where(ignore_mask, 255, targets)

    out = focal_loss(inputs, targets, alpha=0.25, gamma=2,
                     size_average=True, ignore_index=255)
    out = jax.block_until_ready(out)
    ref = _focal_loss_ref(inputs, targets, alpha=0.25, gamma=2,
                          size_average=True, ignore_index=255)
    assert jnp.allclose(out, ref, rtol=1e-5, atol=1e-6), (out, ref)

    # Second test: odd spatial size (exercises lane padding), multiple reduction
    # steps (small tile_rows), and sum (size_average=False) path.
    k4, k5, k6 = jax.random.split(jax.random.PRNGKey(1), 3)
    N2, C2, H2, W2 = 2, 4, 33, 47
    inputs2 = jax.random.normal(k4, (N2, C2, H2, W2), dtype=jnp.float32)
    targets2 = jax.random.randint(k5, (N2, H2, W2), 0, C2, dtype=jnp.int32)
    targets2 = jnp.where(jax.random.bernoulli(k6, 0.1, (N2, H2, W2)), 255, targets2)
    out2 = jax.block_until_ready(
        focal_loss(inputs2, targets2, size_average=False, tile_rows=8))
    ref2 = _focal_loss_ref(inputs2, targets2, size_average=False)
    assert jnp.allclose(out2, ref2, rtol=1e-5, atol=1e-4), (out2, ref2)

    # Third test: bf16 logits streamed in native dtype, f32 math in-kernel.
    out3 = jax.block_until_ready(
        focal_loss(inputs.astype(jnp.bfloat16), targets))
    ref3 = _focal_loss_ref(inputs.astype(jnp.bfloat16), targets)
    assert jnp.allclose(out3, ref3, rtol=1e-4, atol=1e-5), (out3, ref3)

    print("KERNEL_OK")
</pallas_src>

<mosaic_0001>
module attributes {stable_mosaic.version = 11 : i64} {
  func.func @_focal_loss_kernel(%arg0: i32, %arg1: i32, %arg2: memref<1x4x8x128xf32, #tpu.memory_space<vmem>>, %arg3: memref<1x8x128xi32, #tpu.memory_space<vmem>>, %arg4: memref<1x8x128xf32, #tpu.memory_space<vmem>>) attributes {dimension_semantics = [#tpu.dimension_semantics<parallel>, #tpu.dimension_semantics<arbitrary>], iteration_bounds = array<i64: 2, 1>, scalar_prefetch = 0 : i64, scratch_operands = 0 : i64, tpu.core_type = #tpu.core_type<tc>, window_params = [{transform_indices = @transform_0, window_bounds = array<i64: 1, 4, 8, 128>}, {transform_indices = @transform_1, window_bounds = array<i64: 1, 8, 128>}, {transform_indices = @transform_2, window_bounds = array<i64: 1, 8, 128>}]} {
    %c0_i32 = arith.constant 0 : i32
    %0 = arith.cmpi eq, %arg1, %c0_i32 : i32
    %1 = arith.extui %0 : i1 to i32
    %c0_i32_0 = arith.constant 0 : i32
    %2 = arith.cmpi ne, %1, %c0_i32_0 : i32
    scf.if %2 {
      %cst_20 = arith.constant 0.000000e+00 : f32
      %76 = vector.broadcast %cst_20 : f32 to vector<8x128xf32>
      %c0_21 = arith.constant 0 : index
      %c0_22 = arith.constant 0 : index
      %c0_23 = arith.constant 0 : index
      %77 = vector.load %arg4[%c0_21, %c0_22, %c0_23] : memref<1x8x128xf32, #tpu.memory_space<vmem>>, vector<1x8x128xf32>
      %78 = vector.shape_cast %77 : vector<1x8x128xf32> to vector<8x128xf32>
      %79 = vector.shape_cast %76 : vector<8x128xf32> to vector<1x8x128xf32>
      tpu.vector_store %arg4[%c0_21, %c0_22, %c0_23], %79 {strides = array<i32>} : memref<1x8x128xf32, #tpu.memory_space<vmem>>, vector<1x8x128xf32>,
    } else {
    }
    %c0 = arith.constant 0 : index
    %c0_1 = arith.constant 0 : index
    %c0_2 = arith.constant 0 : index
    %3 = vector.load %arg3[%c0, %c0_1, %c0_2] : memref<1x8x128xi32, #tpu.memory_space<vmem>>, vector<1x8x128xi32>
    %4 = vector.shape_cast %3 : vector<1x8x128xi32> to vector<8x128xi32>
    %c0_3 = arith.constant 0 : index
    %c0_4 = arith.constant 0 : index
    %c0_5 = arith.constant 0 : index
    %c0_6 = arith.constant 0 : index
    %5 = vector.load %arg2[%c0_3, %c0_4, %c0_5, %c0_6] : memref<1x4x8x128xf32, #tpu.memory_space<vmem>>, vector<1x4x8x128xf32>
    %6 = vector.shape_cast %5 : vector<1x4x8x128xf32> to vector<4x8x128xf32>
    %7 = vector.extract_strided_slice %6 {offsets = [0, 0, 0], sizes = [1, 8, 128], strides = [1, 1, 1]} : vector<4x8x128xf32> to vector<1x8x128xf32>
    %8 = vector.shape_cast %7 : vector<1x8x128xf32> to vector<8x128xf32>
    %9 = vector.extract_strided_slice %6 {offsets = [1, 0, 0], sizes = [1, 8, 128], strides = [1, 1, 1]} : vector<4x8x128xf32> to vector<1x8x128xf32>
    %10 = vector.shape_cast %9 : vector<1x8x128xf32> to vector<8x128xf32>
    %11 = arith.maximumf %8, %10 : vector<8x128xf32>
    %12 = vector.extract_strided_slice %6 {offsets = [2, 0, 0], sizes = [1, 8, 128], strides = [1, 1, 1]} : vector<4x8x128xf32> to vector<1x8x128xf32>
    %13 = vector.shape_cast %12 : vector<1x8x128xf32> to vector<8x128xf32>
    %14 = arith.maximumf %11, %13 : vector<8x128xf32>
    %15 = vector.extract_strided_slice %6 {offsets = [3, 0, 0], sizes = [1, 8, 128], strides = [1, 1, 1]} : vector<4x8x128xf32> to vector<1x8x128xf32>
    %16 = vector.shape_cast %15 : vector<1x8x128xf32> to vector<8x128xf32>
    %17 = arith.maximumf %14, %16 : vector<8x128xf32>
    %cst = arith.constant 0.000000e+00 : f32
    %18 = vector.broadcast %cst : f32 to vector<8x128xf32>
    %cst_7 = arith.constant 0.000000e+00 : f32
    %19 = vector.broadcast %cst_7 : f32 to vector<8x128xf32>
    %20 = vector.extract_strided_slice %6 {offsets = [0, 0, 0], sizes = [1, 8, 128], strides = [1, 1, 1]} : vector<4x8x128xf32> to vector<1x8x128xf32>
    %21 = vector.shape_cast %20 : vector<1x8x128xf32> to vector<8x128xf32>
    %22 = arith.subf %21, %17 : vector<8x128xf32>
    %23 = math.exp %22 : vector<8x128xf32>
    %24 = arith.addf %18, %23 : vector<8x128xf32>
    %c0_i32_8 = arith.constant 0 : i32
    %25 = vector.broadcast %c0_i32_8 : i32 to vector<8x128xi32>
    %26 = arith.cmpi eq, %4, %25 : vector<8x128xi32>
    %27 = arith.select %26, %21, %19 : vector<8x128xi1>, vector<8x128xf32>
    %28 = vector.extract_strided_slice %6 {offsets = [1, 0, 0], sizes = [1, 8, 128], strides = [1, 1, 1]} : vector<4x8x128xf32> to vector<1x8x128xf32>
    %29 = vector.shape_cast %28 : vector<1x8x128xf32> to vector<8x128xf32>
    %30 = arith.subf %29, %17 : vector<8x128xf32>
    %31 = math.exp %30 : vector<8x128xf32>
    %32 = arith.addf %24, %31 : vector<8x128xf32>
    %c1_i32 = arith.constant 1 : i32
    %33 = vector.broadcast %c1_i32 : i32 to vector<8x128xi32>
    %34 = arith.cmpi eq, %4, %33 : vector<8x128xi32>
    %35 = arith.select %34, %29, %27 : vector<8x128xi1>, vector<8x128xf32>
    %36 = vector.extract_strided_slice %6 {offsets = [2, 0, 0], sizes = [1, 8, 128], strides = [1, 1, 1]} : vector<4x8x128xf32> to vector<1x8x128xf32>
    %37 = vector.shape_cast %36 : vector<1x8x128xf32> to vector<8x128xf32>
    %38 = arith.subf %37, %17 : vector<8x128xf32>
    %39 = math.exp %38 : vector<8x128xf32>
    %40 = arith.addf %32, %39 : vector<8x128xf32>
    %c2_i32 = arith.constant 2 : i32
    %41 = vector.broadcast %c2_i32 : i32 to vector<8x128xi32>
    %42 = arith.cmpi eq, %4, %41 : vector<8x128xi32>
    %43 = arith.select %42, %37, %35 : vector<8x128xi1>, vector<8x128xf32>
    %44 = vector.extract_strided_slice %6 {offsets = [3, 0, 0], sizes = [1, 8, 128], strides = [1, 1, 1]} : vector<4x8x128xf32> to vector<1x8x128xf32>
    %45 = vector.shape_cast %44 : vector<1x8x128xf32> to vector<8x128xf32>
    %46 = arith.subf %45, %17 : vector<8x128xf32>
    %47 = math.exp %46 : vector<8x128xf32>
    %48 = arith.addf %40, %47 : vector<8x128xf32>
    %c3_i32 = arith.constant 3 : i32
    %49 = vector.broadcast %c3_i32 : i32 to vector<8x128xi32>
    %50 = arith.cmpi eq, %4, %49 : vector<8x128xi32>
    %51 = arith.select %50, %45, %43 : vector<8x128xi1>, vector<8x128xf32>
    %52 = math.log %48 : vector<8x128xf32>
    %53 = arith.addf %52, %17 : vector<8x128xf32>
    %c255_i32 = arith.constant 255 : i32
    %54 = vector.broadcast %c255_i32 : i32 to vector<8x128xi32>
    %55 = arith.cmpi ne, %4, %54 : vector<8x128xi32>
    %56 = arith.subf %53, %51 : vector<8x128xf32>
    %cst_9 = arith.constant 0.000000e+00 : f32
    %57 = vector.broadcast %cst_9 : f32 to vector<8x128xf32>
    %58 = arith.select %55, %56, %57 : vector<8x128xi1>, vector<8x128xf32>
    %cst_10 = arith.constant 0.000000e+00 : f32
    %59 = vector.broadcast %cst_10 : f32 to vector<8x128xf32>
    %60 = arith.maximumf %58, %59 : vector<8x128xf32>
    %cst_11 = arith.constant 0.000000e+00 : f32
    %61 = vector.broadcast %cst_11 : f32 to vector<8x128xf32>
    %62 = arith.subf %61, %60 : vector<8x128xf32>
    %63 = math.exp %62 : vector<8x128xf32>
    %cst_12 = arith.constant 1.000000e+00 : f32
    %64 = vector.broadcast %cst_12 : f32 to vector<8x128xf32>
    %65 = arith.subf %64, %63 : vector<8x128xf32>
    %66 = arith.mulf %65, %65 : vector<8x128xf32>
    %cst_13 = arith.constant 2.500000e-01 : f32
    %67 = vector.broadcast %cst_13 : f32 to vector<8x128xf32>
    %68 = arith.mulf %67, %66 : vector<8x128xf32>
    %69 = arith.mulf %68, %60 : vector<8x128xf32>
    %c0_14 = arith.constant 0 : index
    %c0_15 = arith.constant 0 : index
    %c0_16 = arith.constant 0 : index
    %70 = vector.load %arg4[%c0_14, %c0_15, %c0_16] : memref<1x8x128xf32, #tpu.memory_space<vmem>>, vector<1x8x128xf32>
    %71 = vector.shape_cast %70 : vector<1x8x128xf32> to vector<8x128xf32>
    %72 = arith.addf %71, %69 : vector<8x128xf32>
    %c0_17 = arith.constant 0 : index
    %c0_18 = arith.constant 0 : index
    %c0_19 = arith.constant 0 : index
    %73 = vector.load %arg4[%c0_17, %c0_18, %c0_19] : memref<1x8x128xf32, #tpu.memory_space<vmem>>, vector<1x8x128xf32>
    %74 = vector.shape_cast %73 : vector<1x8x128xf32> to vector<8x128xf32>
    %75 = vector.shape_cast %72 : vector<8x128xf32> to vector<1x8x128xf32>
    tpu.vector_store %arg4[%c0_17, %c0_18, %c0_19], %75 {strides = array<i32>} : memref<1x8x128xf32, #tpu.memory_space<vmem>>, vector<1x8x128xf32>,
    return
  }
  func.func @transform_0(%arg0: i32, %arg1: i32) -> (i32, i32, i32, i32) {
    %c0_i32 = arith.constant 0 : i32
    %c0_i32_0 = arith.constant 0 : i32
    %c0_i32_1 = arith.constant 0 : i32
    return %arg0, %c0_i32, %arg1, %c0_i32_0 : i32, i32, i32, i32
  }
  func.func @transform_1(%arg0: i32, %arg1: i32) -> (i32, i32, i32) {
    %c0_i32 = arith.constant 0 : i32
    %c0_i32_0 = arith.constant 0 : i32
    return %arg0, %arg1, %c0_i32 : i32, i32, i32
  }
  func.func @transform_2(%arg0: i32, %arg1: i32) -> (i32, i32, i32) {
    %c0_i32 = arith.constant 0 : i32
    %c0_i32_0 = arith.constant 0 : i32
    %c0_i32_1 = arith.constant 0 : i32
    return %arg0, %c0_i32, %c0_i32_0 : i32, i32, i32
  }
}

</mosaic_0001>

<bundles_post_ra>
// kernel: tpu_custom_call.1
= control target key start
LH: loop header
LB: loop body
LE: loop exit
PB: predicated region body
PF: predicated region fallthrough
CT: control target
= control target key end

     0   :  { %7 = vsyncpa [#allocation3], 0  ;;  %s802_s0 = inlined_call_operand.hbm [shape: f32[2,4,8,128], index: 0, kind: input, shape index: {}]   ;;  %s803_s1 = inlined_call_operand.hbm [shape: s32[2,8,128], index: 1, kind: input, shape index: {}]   ;;  %s804_s2 = inlined_call_operand.hbm [shape: f32[2,8,128], index: 2, kind: output, shape index: {}]  }
   0x1   :  { %9 = vsyncpa [#allocation3 + $0x1], 0 }
   0x2   :  { %10 = vsyncpa [#allocation6], 0 }
   0x3   :  { %12 = vsyncpa [#allocation6 + $0x1], 0 }
   0x4   :  { %13 = vsyncpa [#allocation4], 0 }
   0x5   :  { %15 = vsyncpa [#allocation4 + $0x1], 0  ;;  %s660_s9 = smov 0   ;;  %s662_s10 = smov 0  }
   0x6   :  { %s664_s11 = smov 0   ;;  %s666_s12 = smov 0  }
   0x7   :  { %s668_s13 = smov 0   ;;  %s670_s14 = smov 0  }
   0x8 LB: > { %s395_s15 = sadd.s32 4294967295, %s641_s14   ;;  %s396_s16 = sadd.s32 4294967294, %s641_s14   ;;  %s641_s14 = sphi %s670_s14, %s21_s14   ;;  %s637_s13 = sphi %s668_s13, %s814_s13   ;;  %s633_s12 = sphi %s666_s12, %s813_s12   ;;  %s629_s11 = sphi %s664_s11, %s812_s11   ;;  %s625_s10 = sphi %s662_s10, %s811_s10   ;;  %s621_s9 = sphi %s660_s9, %s810_s9  }
   0x9   : > { %s33_s17 = sadd.s32 1, %s637_s13  ;;  %s42_s18 = sadd.s32 1, %s629_s11 }
   0xa   : > { %p35_p0 = scmp.ge.s32.totalorder %s33_s17, 2  ;;  %p49_p1 = scmp.ne.s32.totalorder %s629_s11, %s625_s10 }
   0xb   : > { %p50_p2 = scmp.eq.s32.totalorder %s641_s14, 0  ;;  %p55_p3 = scmp.ne.s32.totalorder %s625_s10, %s621_s9 }
   0xc   : > { %s816_s17 = smov (%p35_p0, %s33_s17), 0  ;;  %p56_p5 = scmp.eq.s32.totalorder %s395_s15, 0 }
   0xd   : > { %p701_p4 = por %p50_p2, %p49_p1  ;;  %s37_s20 = ssub.s32 %s637_s13, %s816_s17 }
   0xe   : > { %p107_p6 = scmp.eq.s32.totalorder %s395_s15, 1  ;;  %p40_p7 = scmp.eq.s32.totalorder %s37_s20, 0 }
   0xf   : > { %p707_p8 = por %p56_p5, %p55_p3  ;;  %p113_p10 = scmp.eq.s32.totalorder %s396_s16, 1 }
  0x10   : > { %p711_p9 = por %p107_p6, %p49_p1  ;;  %p398_p12 = scmp.ge.s32.totalorder %s641_s14, 2 }
  0x11   : > { %s716_s23 = scalar_select %p40_p7, %s629_s11, %s42_s18  }
  0x12   : > { %p718_p11 = por %p113_p10, %p55_p3  ;;  %p430_p13 = scmp.lt.s32.totalorder %s641_s14, 2 }
  0x13   : > { %s133_s25 = sand.u32 1, %s629_s11   ;;  %s412_s27 = sshll.u32 %s637_s13, 5 }
  0x14   : > { %s399_s26 = sshll.u32 %s133_s25, 5  ;;  %s143_s30 = scalar_lea.hbm %s802_s0, %s412_s27 }
  0x15   : > { %s137_s3 = scalar_lea.vmem [#allocation2], %s399_s26  ;;  %s144_s5 = sshll.u32 %s143_s30, 4  ;;  %s145_s5 = int_to_ptr.hbm [resolvable:$true] %s144_s5 }
  0x16   : > { %s146_s4 = sshll.u32 %s137_s3, 4  ;;  %p731_p0 = pnand %p430_p13, %p701_p4  ;;  %s147_s4 = int_to_ptr.vmem [resolvable:$true] %s146_s4 }
  0x17   : > { %p404_p1 = scmp.ge.s32.totalorder %s641_s14, 1  ;;  %s134_s7 = scalar_lea.sflag [#allocation3], %s133_s25 }
  0x18   : > { %s643_s8 = smov 128   ;;  %s644_s15 = smov 8  }
  0x19   : > { %422 = dma.hbm_to_vmem [thread:$0]  (!%p731_p0), %s145_s5, 512, %s147_s4, %s134_s7, %s643_s8, %s643_s8, %s644_s15  }
  0x1a   : > { %p174_p2 = scmp.lt.s32.totalorder %s641_s14, 3  ;;  %s402_s16 = sshll.u32 %s133_s25, 3 }
  0x1b   : > { %s403_s18 = sshll.u32 %s637_s13, 3  ;;  %s160_s27 = scalar_lea.vmem [#allocation5], %s402_s16 }
  0x1c   : > { %p175_p3 = pnand %p404_p1, %p174_p2  ;;  %s165_s19 = scalar_lea.hbm %s803_s1, %s403_s18 }
  0x1d   : > { %s169_s28 = sshll.u32 %s160_s27, 4  ;;  %s167_s29 = sshll.u32 %s165_s19, 4  ;;  %s170_s28 = int_to_ptr.vmem [resolvable:$true] %s169_s28  ;;  %s168_s29 = int_to_ptr.hbm [resolvable:$true] %s167_s29 }
  0x1e   : > { %s157_s30 = scalar_lea.sflag [#allocation6], %s133_s25  ;;  %178 = sbr.rel (%p175_p3) target bundleno = 102 (0x66), region = 28 }
  0x1f   : > { %425 = dma.hbm_to_vmem [thread:$0]  (!%p731_p0), %s168_s29, 128, %s170_s28, %s157_s30  }
  0x20   : > { %s746_s3 = sand.u32 (!%p175_p3), 1, %s625_s10  }
  0x21   : > { %s405_s4 = sshll.u32 (!%p175_p3), %s746_s3, 5  ;;  %s181_s5 = scalar_lea.sflag (!%p175_p3), [#allocation3], %s746_s3 }
  0x22   : > { %s184_s7 = scalar_lea.vmem (!%p175_p3), [#allocation2], %s405_s4 }
  0x23   : > { %608 = dma.done.wait (%p707_p8), %s181_s5, 512  }
  0x24   : > { %610 = vsyncadd (%p707_p8), %s181_s5, 4294966784  ;;  %s406_s25 = sshll.u32 %s746_s3, 3  ;;  %s191_s6 = scalar_lea.sflag [#allocation6], %s746_s3 }
  0x25   : > { %s194_s8 = scalar_lea.vmem [#allocation5], %s406_s25 }
  0x26   : > { %612 = dma.done.wait (%p707_p8), %s191_s6, 128  }
  0x27   : > { %614 = vsyncadd (%p707_p8), %s191_s6, 4294967168  ;;  %v227_v0 = vld [vmem:[%s184_s7] sm:$0xff]  ;;  %v228_v1 = vld [vmem:[%s184_s7 + $0x8] sm:$0xff]  ;;  %s409_s21 = sshll.u32 %s633_s12, 3  ;;  %s220_s20 = scalar_lea.vmem [#allocation7], %s406_s25 }
  0x28   : > { %v229_v2 = vld [vmem:[%s184_s7 + $0x10] sm:$0xff]  ;;  %v231_v3 = vmax.f32 %v227_v0, %v228_v1  ;;  %v230_v4 = vld [vmem:[%s184_s7 + $0x18] sm:$0xff]  ;;  %v226_v17 = vld [vmem:[%s194_s8] sm:$0xff]  ;;  %s286_s18 = scalar_lea.hbm %s804_s2, %s409_s21  ;;  %s288_s26 = sshll.u32 %s220_s20, 4  ;;  %s289_s26 = int_to_ptr.vmem [resolvable:$true] %s288_s26 }
  0x29   : > { %vm238_vm0 = vcmp.eq.s32.totalorder %v226_v17, 0  ;;  %vm244_vm1 = vcmp.eq.s32.totalorder %v226_v17, 1  ;;  %vm250_vm2 = vcmp.eq.s32.totalorder %v226_v17, 2  ;;  %vm256_vm3 = vcmp.eq.s32.totalorder %v226_v17, 3  ;;  %s290_s19 = sshll.u32 %s286_s18, 4  ;;  %s276_s27 = scalar_lea.sflag [#allocation4], %s746_s3  ;;  %s291_s19 = int_to_ptr.hbm [resolvable:$true] %s290_s19 }
  0x2a   : > { %v232_v5 = vmax.f32 %v231_v3, %v229_v2  ;;  %v239_v23 = vsel %vm238_vm0, %v227_v0, 0.0  ;;  %vm261_vm4 = vcmp.ne.s32.totalorder %v226_v17, 255  ;;  %s569_s28 = sshra.s32 %s291_s19, 4  ;;  %s575_s4 = scalar_lea.hbm %s804_s2, 16  ;;  %s570_s28 = int_to_ptr.hbm [resolvable:$true] %s569_s28 }
  0x2b   : > { %v245_v24 = vsel %vm244_vm1, %v228_v1, %v239_v23  ;;  %s571_s12 = scalar_lea.hbm %s570_s28, 8  ;;  %p576_p7 = scmp.lt.s32.totalorder %s570_s28, %s804_s2 }
  0x2c   : > { %v233_v6 = vmax.f32 %v232_v5, %v230_v4  ;;  %v251_v25 = vsel %vm250_vm2, %v229_v2, %v245_v24  ;;  %p572_p4 = scmp.ne.s32.totalorder %s570_s28, %s571_s12  ;;  %p577_p8 = scmp.lt.s32.totalorder %s575_s4, %s571_s12 }
  0x2d   : > { %v257_v28 = vsel %vm256_vm3, %v230_v4, %v251_v25 }
  0x2e   : > { %v234_v7 = vsub.f32 %v227_v0, %v233_v6  ;;  %v240_v8 = vsub.f32 %v228_v1, %v233_v6  ;;  %v246_v9 = vsub.f32 %v229_v2, %v233_v6  ;;  %v252_v10 = vsub.f32 %v230_v4, %v233_v6  ;;  %p573_p5 = pnand %p572_p4, %p711_p9  ;;  %p578_p10 = por %p577_p8, %p576_p7 }
  0x30   : > { %v235_v11 = vmul.f32 1.442695, %v234_v7  ;;  %v241_v12 = vmul.f32 1.442695, %v240_v8  ;;  %v247_v13 = vmul.f32 1.442695, %v246_v9  ;;  %p574_p6 = pneg %p573_p5 }
  0x31   : > { %v253_v14 = vmul.f32 1.442695, %v252_v10 }
  0x32   : > { %483 = vpow2.f32 %v235_v11  ;;  %p579_p13 = pnand %p578_p10, %p574_p6 }
  0x33   : > { %485 = vpow2.f32 %v241_v12 }
  0x34   : > { %487 = vpow2.f32 %v247_v13 }
  0x35   : > { %489 = vpow2.f32 %v253_v14 }
  0x38   : > { %v484_v15 = vpop.eup %483 }
  0x39   : > { %v486_v16 = vpop.eup %485 }
  0x3a   : > { %v488_v18 = vpop.eup %487  ;;  %v243_v19 = vadd.f32 %v486_v16, %v484_v15 }
  0x3b   : > { %v490_v20 = vpop.eup %489 }
  0x3c   : > { %v249_v21 = vadd.f32 %v488_v18, %v243_v19 }
  0x3e   : > { %v255_v22 = vadd.f32 %v490_v20, %v249_v21 }
  0x40   : > { %491 = vlog2.f32 %v255_v22 }
  0x46   : > { %v492_v26 = vpop.eup %491 }
  0x47   : > { %v259_v27 = vmul.f32 0.6931472, %v492_v26 }
  0x49   : > { %v260_v29 = vadd.f32 %v259_v27, %v233_v6 }
  0x4b   : > { %v262_v30 = vsub.f32 %v260_v29, %v257_v28 }
  0x4d   : > { %v263_v31 = vsel %vm261_vm4, %v262_v30, 0.0 }
  0x4e   : > { %v264_v32 = vmax.f32 %v263_v31, 0.0 }
  0x50   : > { %v265_v33 = vsub.f32 0.0, %v264_v32 }
  0x52   : > { %v266_v34 = vmul.f32 1.442695, %v265_v33 }
  0x54   : > { %493 = vpow2.f32 %v266_v34 }
  0x5a   : > { %v494_v35 = vpop.eup %493 }
  0x5b   : > { %v268_v36 = vsub.f32 1.0, %v494_v35 }
  0x5d   : > { %v269_v37 = vmul.f32 %v268_v36, %v268_v36 }
  0x5f   : > { %v270_v38 = vmul.f32 0.25, %v269_v37 }
  0x61   : > { %v271_v39 = vmul.f32 %v270_v38, %v264_v32 }
  0x63   : > { %274 = vst [vmem:[%s220_s20] sm:$0xff] %v271_v39 }
  0x64   : > { %582 = shalt.err (!%p579_p13)
}
  0x65   : > { %417 = dma.vmem_to_hbm [thread:$0]  (%p711_p9), %s289_s26, 128, %s291_s19, %s276_s27  }
  0x66 PF: > { %s302_s3 = sand.u32 1, %s621_s9   ;;  %p427_p0 = pnand %p398_p12, %p718_p11 }
  0x67   : > { %s303_s25 = scalar_lea.sflag [#allocation4], %s302_s3 }
  0x68   : > { %p428_p1 = pneg %p427_p0 }
  0x6a   : > { %616 = dma.done.wait (%p428_p1), %s303_s25, 128  }
  0x6b   : > { %618 = vsyncadd (%p428_p1), %s303_s25, 4294967168  ;;  %s21_s14 = sadd.s32 1, %s641_s14   ;;  %s810_s9 = smov %s625_s10 }
  0x6c   : > { %p18_p2 = scmp.ge.s32.totalorder %s21_s14, 4   ;;  %s811_s10 = smov %s629_s11 }
  0x6d   : > { %s812_s11 = smov %s716_s23  ;;  %s813_s12 = smov %s637_s13 }
  0x6e   : > { %s814_s13 = smov %s816_s17  ;;  %20 = sbr.rel (!%p18_p2) target bundleno = 8 (0x8), region = 90 }
  0x73   :  { %309 = vsyncpa [#allocation3], 1 }
  0x74   :  { %311 = vsyncpa [#allocation3 + $0x1], 1 }
  0x75   :  { %312 = vsyncpa [#allocation6], 1 }
  0x76   :  { %314 = vsyncpa [#allocation6 + $0x1], 1 }
  0x77   :  { %315 = vsyncpa [#allocation4], 1 }
  0x78   :  { %317 = vsyncpa [#allocation4 + $0x1], 1 }

</bundles_post_ra>
